<compile_context>
chip_gen: v5e
topology: v5e:2x2
jax: 0.10.0
libtpu: 0.0.40
codegen_flags: <defaults>
</compile_context>

<pallas_src>
import jax
import jax.numpy as jnp
from jax.experimental import pallas as pl
from jax.experimental.pallas import tpu as pltpu

_LANE = 128  # TPU vreg lane width


def _round_up(x, m):
    return (x + m - 1) // m * m


def textcnn_kernel(x_ref, m_ref, bc_ref, wf_ref, bf_ref, out_ref):
    """Fused embedding-gather + Conv2d(1,C,(2,E)) + ReLU + MaxPool + Linear."""
    tb = x_ref.shape[0]
    kp = m_ref.shape[0]                         # lane-padded 3*V (one-hot width)
    hi = jax.lax.Precision.HIGHEST

    x = x_ref[...]                              # [tb, 3] int32, pre-shifted by h*V
    iota = jax.lax.broadcasted_iota(jnp.int32, (tb, kp), 1)
    # single iota + three OR'd compares (disjoint ranges) -> one cast
    onehot = ((iota == x[:, 0:1]) |
              (iota == x[:, 1:2]) |
              (iota == x[:, 2:3])).astype(jnp.float32)          # [tb, kp]

    # fused embedding gather + both conv rows (all linear) -> ONE MXU matmul;
    # conv row 0 lands in lanes [0,128), conv row 1 in lanes [128,256).
    conv = jnp.dot(onehot, m_ref[...],
                   preferred_element_type=jnp.float32,
                   precision=hi) + bc_ref[...]
    conv = jnp.maximum(conv, 0.0)                               # ReLU
    # MaxPool2d((2,1)): max of the two conv rows == the two 128-lane halves
    pooled = jnp.maximum(conv[:, :_LANE], conv[:, _LANE:])      # [tb, 128]
    # fc: [tb,128] @ [128,NC]; rows >= C of wf (and lanes >= C of pooled) are 0
    out_ref[...] = (jnp.dot(pooled, wf_ref[...],
                            preferred_element_type=jnp.float32,
                            precision=hi) + bf_ref[...])


def _tpu_vmem_capacity_bytes():
    try:
        return int(pltpu.get_tpu_info().vmem_capacity_bytes)
    except Exception:
        return 64 * 1024 * 1024          # conservative (v7x per-TensorCore VMEM)


def _multi_tensorcore_device():
    # Chips whose JAX device spans >1 TensorCore (megacore): v4, v5p, v7x.
    try:
        kind = jax.devices()[0].device_kind.lower()
    except Exception:
        return False
    return ("v4" in kind) or ("v5p" in kind) or ("7" in kind)


def textcnn_forward(X, emb_table, conv_w, conv_b, fc_w, fc_b, *, tb=None):
    """Pallas TextCNN forward. X: [B, 3] int32 token ids."""
    B, S = X.shape
    assert S == 3, "fc = Linear(output_channels, num_classes) implies seq_len == 3"
    V, E = emb_table.shape
    C = conv_w.shape[0]                  # output_channels
    NC = fc_w.shape[0]                   # num_classes
    assert C <= _LANE, "output_channels must fit one 128-lane vreg half"

    hi = jax.lax.Precision.HIGHEST
    emb = emb_table.astype(jnp.float32)
    w0 = conv_w[:, 0, 0, :].astype(jnp.float32)          # [C, E] top conv row
    w1 = conv_w[:, 0, 1, :].astype(jnp.float32)          # [C, E] bottom conv row
    a = jnp.dot(emb, w0.T, precision=hi)                 # [V, C]
    b = jnp.dot(emb, w1.T, precision=hi)                 # [V, C]

    # TODO(synk): for realistic vocabularies (V >= ~4K) the resident one-hot
    # weight and the [tb, 3V] one-hot no longer fit VMEM; switch to a
    # scalar-prefetch / DMA gather of the pre-folded rows (a[x0]+b[x1],
    # a[x1]+b[x2]) while keeping the same folding math.
    kp = _round_up(3 * V, _LANE)                          # one-hot / K width
    M = jnp.zeros((kp, 2 * _LANE), jnp.float32)
    M = M.at[0 * V:1 * V, 0:C].set(a)                     # conv row 0: a[x0]
    M = M.at[1 * V:2 * V, 0:C].set(b)                     #             b[x1]
    M = M.at[1 * V:2 * V, _LANE:_LANE + C].set(a)         # conv row 1: a[x1]
    M = M.at[2 * V:3 * V, _LANE:_LANE + C].set(b)         #             b[x2]
    bc = jnp.zeros((1, 2 * _LANE), jnp.float32)
    bc = bc.at[0, 0:C].set(conv_b).at[0, _LANE:_LANE + C].set(conv_b)
    wf = jnp.zeros((_LANE, NC), jnp.float32).at[:C, :].set(fc_w.astype(jnp.float32).T)
    bf = fc_b.astype(jnp.float32).reshape(1, NC)

    # ---- generation-aware batch tiling & explicit VMEM budget ---------------
    vmem_cap = _tpu_vmem_capacity_bytes()
    multi_tc = _multi_tensorcore_device()
    # per-row VMEM bytes: double-buffered X/out blocks (lane-padded to 128)
    # + in-kernel temporaries (onehot, conv, pooled) with slack
    per_row = 4 * (2 * _LANE + 2 * _LANE + 2 * kp + 2 * _LANE + 2 * _LANE)
    weight_bytes = 2 * 4 * (kp * 2 * _LANE + 8 * 2 * _LANE + _LANE * _LANE + 8 * _LANE)
    budget = min(vmem_cap // 2, 48 * 1024 * 1024)
    if tb is None:
        cap = max(8, (budget - weight_bytes) // per_row // 8 * 8)
        cap = min(cap, 8192)                      # amortize ~0.35us/step overhead
        # only multi-TC chips benefit from >=2 grid steps on the parallel axis
        want = pl.cdiv(B, 2) if (multi_tc and B >= 16) else B
        tb = min(cap, _round_up(max(want, 8), 8))
    tb = _round_up(max(tb, 8), 8)
    Bp = pl.cdiv(B, tb) * tb

    # pre-shifted ids so the kernel compares against a single iota
    Xs = X.astype(jnp.int32) + jnp.arange(3, dtype=jnp.int32)[None, :] * V
    if Bp != B:                                    # pad only when actually ragged
        Xs = jnp.pad(Xs, ((0, Bp - B), (0, 0)))
    grid = (Bp // tb,)

    need = weight_bytes + per_row * tb + 2 * 1024 * 1024
    vmem_limit = int(min(max(32 * 1024 * 1024, need), vmem_cap * 3 // 4))

    flops = 2 * Bp * kp * 2 * _LANE + 2 * Bp * _LANE * NC
    bytes_accessed = (Bp * S * 4 + Bp * NC * 4 +
                      (kp * 2 * _LANE + 2 * _LANE + _LANE * NC + NC) * 4)

    out = pl.pallas_call(
        textcnn_kernel,
        out_shape=jax.ShapeDtypeStruct((Bp, NC), jnp.float32),
        grid=grid,
        in_specs=[
            pl.BlockSpec((tb, S), lambda i: (i, 0)),            # shifted token ids
            pl.BlockSpec((kp, 2 * _LANE), lambda i: (0, 0)),    # fused emb+conv W
            pl.BlockSpec((1, 2 * _LANE), lambda i: (0, 0)),     # conv bias x2
            pl.BlockSpec((_LANE, NC), lambda i: (0, 0)),        # fc W (NC cols only)
            pl.BlockSpec((1, NC), lambda i: (0, 0)),            # fc b
        ],
        out_specs=pl.BlockSpec((tb, NC), lambda i: (i, 0)),     # dense output
        compiler_params=pltpu.CompilerParams(
            dimension_semantics=("parallel",),
            vmem_limit_bytes=vmem_limit),
        cost_estimate=pl.CostEstimate(
            flops=flops, transcendentals=0, bytes_accessed=bytes_accessed),
    )(Xs, M, bc, wf, bf)
    return out if Bp == B else out[:B]


def textcnn_ref(X, emb_table, conv_w, conv_b, fc_w, fc_b):
    """Pure-JAX reference matching PyTorch semantics exactly."""
    B, S = X.shape
    C = conv_w.shape[0]
    hi = jax.lax.Precision.HIGHEST
    ebd = emb_table[X]                                   # [B, S, E]
    L = S - 1
    rows = []
    for h in range(L):
        r = (jnp.einsum('be,ce->bc', ebd[:, h, :], conv_w[:, 0, 0, :],
                        precision=hi) +
             jnp.einsum('be,ce->bc', ebd[:, h + 1, :], conv_w[:, 0, 1, :],
                        precision=hi))
        rows.append(r)
    conv = jnp.stack(rows, axis=2) + conv_b[None, :, None]   # [B, C, L]
    conv = jnp.maximum(conv, 0.0)
    P = L // 2
    pooled = jnp.max(conv[:, :, :2 * P].reshape(B, C, P, 2), axis=3)  # [B,C,P]
    flat = pooled.reshape(B, -1)
    return jnp.dot(flat, fc_w.T, precision=hi) + fc_b


if __name__ == "__main__":
    # hyper-params implied by the module (sequence_length fixed to 3)
    vocab_size = 16
    embedding_size = 8
    sequence_length = 3
    num_classes = 2
    output_channels = 3
    batch = 16

    key = jax.random.PRNGKey(0)
    k_emb, k_cw, k_cb, k_fw, k_fb, k_x = jax.random.split(key, 6)

    # deterministic synthetic parameters (same shapes as the PyTorch module)
    emb_table = jax.random.normal(k_emb, (vocab_size, embedding_size),
                                  dtype=jnp.float32)
    conv_w = jax.random.normal(
        k_cw, (output_channels, 1, 2, embedding_size), dtype=jnp.float32) * 0.5
    conv_b = jax.random.normal(k_cb, (output_channels,), dtype=jnp.float32) * 0.1
    fc_w = jax.random.normal(k_fw, (num_classes, output_channels),
                             dtype=jnp.float32) * 0.5
    fc_b = jax.random.normal(k_fb, (num_classes,), dtype=jnp.float32) * 0.1

    # deterministic example input: token ids
    X = jax.random.randint(k_x, (batch, sequence_length), 0, vocab_size,
                           dtype=jnp.int32)

    out = textcnn_forward(X, emb_table, conv_w, conv_b, fc_w, fc_b)
    out = jax.block_until_ready(out)

    ref = textcnn_ref(X, emb_table, conv_w, conv_b, fc_w, fc_b)
    assert out.shape == (batch, num_classes)
    assert jnp.allclose(out, ref, atol=1e-4, rtol=1e-4), (out, ref)

    print("KERNEL_OK")
</pallas_src>

<mosaic_0001>
module attributes {stable_mosaic.version = 11 : i64} {
  func.func @textcnn_kernel(%arg0: i32, %arg1: memref<16x3xi32, #tpu.memory_space<vmem>>, %arg2: memref<128x256xf32, #tpu.memory_space<vmem>>, %arg3: memref<1x256xf32, #tpu.memory_space<vmem>>, %arg4: memref<128x2xf32, #tpu.memory_space<vmem>>, %arg5: memref<1x2xf32, #tpu.memory_space<vmem>>, %arg6: memref<16x2xf32, #tpu.memory_space<vmem>>) attributes {dimension_semantics = [#tpu.dimension_semantics<parallel>], iteration_bounds = array<i64: 1>, scalar_prefetch = 0 : i64, scratch_operands = 0 : i64, tpu.core_type = #tpu.core_type<tc>, window_params = [{transform_indices = @transform_0, window_bounds = array<i64: 16, 3>}, {pipeline_mode = #tpu.pipeline_mode<synchronous>, transform_indices = @transform_1, window_bounds = array<i64: 128, 256>}, {pipeline_mode = #tpu.pipeline_mode<synchronous>, transform_indices = @transform_2, window_bounds = array<i64: 1, 256>}, {pipeline_mode = #tpu.pipeline_mode<synchronous>, transform_indices = @transform_3, window_bounds = array<i64: 128, 2>}, {pipeline_mode = #tpu.pipeline_mode<synchronous>, transform_indices = @transform_4, window_bounds = array<i64: 1, 2>}, {transform_indices = @transform_5, window_bounds = array<i64: 16, 2>}]} {
    %c0 = arith.constant 0 : index
    %c0_0 = arith.constant 0 : index
    %0 = vector.load %arg1[%c0, %c0_0] : memref<16x3xi32, #tpu.memory_space<vmem>>, vector<16x3xi32>
    %1 = tpu.iota {dimensions = array<i32: 1>} : vector<16x128xi32>
    %2 = vector.extract_strided_slice %0 {offsets = [0, 0], sizes = [16, 1], strides = [1, 1]} : vector<16x3xi32> to vector<16x1xi32>
    %3 = vector.broadcast %2 : vector<16x1xi32> to vector<16x128xi32>
    %4 = arith.cmpi eq, %1, %3 : vector<16x128xi32>
    %5 = vector.extract_strided_slice %0 {offsets = [0, 1], sizes = [16, 1], strides = [1, 1]} : vector<16x3xi32> to vector<16x1xi32>
    %6 = vector.broadcast %5 : vector<16x1xi32> to vector<16x128xi32>
    %7 = arith.cmpi eq, %1, %6 : vector<16x128xi32>
    %8 = arith.ori %4, %7 : vector<16x128xi1>
    %9 = vector.extract_strided_slice %0 {offsets = [0, 2], sizes = [16, 1], strides = [1, 1]} : vector<16x3xi32> to vector<16x1xi32>
    %10 = vector.broadcast %9 : vector<16x1xi32> to vector<16x128xi32>
    %11 = arith.cmpi eq, %1, %10 : vector<16x128xi32>
    %12 = arith.ori %8, %11 : vector<16x128xi1>
    %13 = arith.extui %12 : vector<16x128xi1> to vector<16x128xi32>
    %14 = arith.sitofp %13 : vector<16x128xi32> to vector<16x128xf32>
    %c0_1 = arith.constant 0 : index
    %c0_2 = arith.constant 0 : index
    %15 = vector.load %arg2[%c0_1, %c0_2] : memref<128x256xf32, #tpu.memory_space<vmem>>, vector<128x256xf32>
    %cst = arith.constant dense<0.000000e+00> : vector<16x256xf32>
    %16 = tpu.matmul %14, %15, %cst {dimension_numbers = #tpu.dot_dimension_numbers<[1], [0], [0], [1], [0, 0, 1, 1], [], []>, precision = #tpu.contract_precision<fp32>} : vector<16x128xf32>, vector<128x256xf32>, vector<16x256xf32> -> vector<16x256xf32>
    %c0_3 = arith.constant 0 : index
    %c0_4 = arith.constant 0 : index
    %17 = vector.load %arg3[%c0_3, %c0_4] : memref<1x256xf32, #tpu.memory_space<vmem>>, vector<1x256xf32>
    %18 = vector.broadcast %17 : vector<1x256xf32> to vector<16x256xf32>
    %19 = arith.addf %16, %18 : vector<16x256xf32>
    %cst_5 = arith.constant 0.000000e+00 : f32
    %20 = vector.broadcast %cst_5 : f32 to vector<16x256xf32>
    %21 = arith.maximumf %19, %20 : vector<16x256xf32>
    %22 = vector.extract_strided_slice %21 {offsets = [0, 0], sizes = [16, 128], strides = [1, 1]} : vector<16x256xf32> to vector<16x128xf32>
    %23 = vector.extract_strided_slice %21 {offsets = [0, 128], sizes = [16, 128], strides = [1, 1]} : vector<16x256xf32> to vector<16x128xf32>
    %24 = arith.maximumf %22, %23 : vector<16x128xf32>
    %c0_6 = arith.constant 0 : index
    %c0_7 = arith.constant 0 : index
    %25 = vector.load %arg4[%c0_6, %c0_7] : memref<128x2xf32, #tpu.memory_space<vmem>>, vector<128x2xf32>
    %cst_8 = arith.constant dense<0.000000e+00> : vector<16x2xf32>
    %26 = tpu.matmul %24, %25, %cst_8 {dimension_numbers = #tpu.dot_dimension_numbers<[1], [0], [0], [1], [0, 0, 1, 1], [], []>, precision = #tpu.contract_precision<fp32>} : vector<16x128xf32>, vector<128x2xf32>, vector<16x2xf32> -> vector<16x2xf32>
    %c0_9 = arith.constant 0 : index
    %c0_10 = arith.constant 0 : index
    %27 = vector.load %arg5[%c0_9, %c0_10] : memref<1x2xf32, #tpu.memory_space<vmem>>, vector<1x2xf32>
    %28 = vector.broadcast %27 : vector<1x2xf32> to vector<16x2xf32>
    %29 = arith.addf %26, %28 : vector<16x2xf32>
    %c0_11 = arith.constant 0 : index
    %c0_12 = arith.constant 0 : index
    %30 = vector.load %arg6[%c0_11, %c0_12] : memref<16x2xf32, #tpu.memory_space<vmem>>, vector<16x2xf32>
    tpu.vector_store %arg6[%c0_11, %c0_12], %29 {strides = array<i32>} : memref<16x2xf32, #tpu.memory_space<vmem>>, vector<16x2xf32>,
    return
  }
  func.func @transform_0(%arg0: i32) -> (i32, i32) {
    %c0_i32 = arith.constant 0 : i32
    %c0_i32_0 = arith.constant 0 : i32
    return %arg0, %c0_i32 : i32, i32
  }
  func.func @transform_1(%arg0: i32) -> (i32, i32) {
    %c0_i32 = arith.constant 0 : i32
    %c0_i32_0 = arith.constant 0 : i32
    %c0_i32_1 = arith.constant 0 : i32
    return %c0_i32, %c0_i32_0 : i32, i32
  }
  func.func @transform_2(%arg0: i32) -> (i32, i32) {
    %c0_i32 = arith.constant 0 : i32
    %c0_i32_0 = arith.constant 0 : i32
    %c0_i32_1 = arith.constant 0 : i32
    return %c0_i32, %c0_i32_0 : i32, i32
  }
  func.func @transform_3(%arg0: i32) -> (i32, i32) {
    %c0_i32 = arith.constant 0 : i32
    %c0_i32_0 = arith.constant 0 : i32
    %c0_i32_1 = arith.constant 0 : i32
    return %c0_i32, %c0_i32_0 : i32, i32
  }
  func.func @transform_4(%arg0: i32) -> (i32, i32) {
    %c0_i32 = arith.constant 0 : i32
    %c0_i32_0 = arith.constant 0 : i32
    %c0_i32_1 = arith.constant 0 : i32
    return %c0_i32, %c0_i32_0 : i32, i32
  }
  func.func @transform_5(%arg0: i32) -> (i32, i32) {
    %c0_i32 = arith.constant 0 : i32
    %c0_i32_0 = arith.constant 0 : i32
    return %arg0, %c0_i32 : i32, i32
  }
}

</mosaic_0001>

<bundles_post_ra>
// kernel: tpu_custom_call.1
= control target key start
LH: loop header
LB: loop body
LE: loop exit
PB: predicated region body
PF: predicated region fallthrough
CT: control target
= control target key end

     0   :  { %10 = vsyncpa [#allocation3], 0  ;;  %s1348_s21 = smov [#allocation2]   ;;  %s1349_s23 = smov 256   ;;  %s2224_s0 = inlined_call_operand.vmem [shape: s32[16,3], index: 0, kind: input, shape index: {}]   ;;  %s2225_s1 = inlined_call_operand.hbm [shape: f32[128,256], index: 1, kind: input, shape index: {}]   ;;  %s2226_s2 = inlined_call_operand.vmem [shape: f32[1,256], index: 2, kind: input, shape index: {}]   ;;  %s2227_s3 = inlined_call_operand.vmem [shape: f32[128,2], index: 3, kind: input, shape index: {}]   ;;  %s2228_s4 = inlined_call_operand.vmem [shape: f32[1,2], index: 4, kind: input, shape index: {}]   ;;  %s2229_s5 = inlined_call_operand.vmem [shape: f32[16,2], index: 5, kind: output, shape index: {}]  }
   0x1   :  { %s17_s20 = sshll.u32 %s2225_s1, 4  ;;  %s19_s22 = sshll.u32 %s1348_s21, 4  ;;  %s18_s20 = int_to_ptr.hbm [resolvable:$true] %s17_s20  ;;  %s20_s22 = int_to_ptr.vmem [resolvable:$true] %s19_s22 }
   0x2   :  { %s1350_s24 = smov 16  }
   0x3   :  { %25 = dma.hbm_to_vmem [thread:$0]  %s18_s20, 4096, %s20_s22, [#allocation3], %s1349_s23, %s1349_s23, %s1350_s24  }
   0x4   :  { %1346 = dma.done.wait [#allocation3], 4096  }
   0x5   :  { %1347 = vsyncadd [#allocation3], 4294963200  ;;  %v2237_v0 = vmov 2   ;;  %v1352_v1 = vmov 0   ;;  %v1353_v2 = vmov 1   ;;  %v36_v3 = vld [vmem:[%s2224_s0] sm:$0xff] }
   0x6   :  { %1316 = vset.pattern.permute.xlu1 %v2237_v0  ;;  %1314 = vset.pattern.permute.xlu0 %v1352_v1  ;;  %v37_v4 = vld [vmem:[%s2224_s0 + $0x8] sm:$0xff]  ;;  %v102_v5 = vld [vmem:[#allocation2 + $0xf0] sm:$0xff]  ;;  %v100_v7 = vld [vmem:[#allocation2 + $0xe0] sm:$0xff]  ;;  %vm1252_vm10 = vcmask 15360  }
   0x7   :  { %1318 = vset.pattern.permute.xlu2 %v1353_v2  ;;  %59 = vperm.xlu1 %1316, %v36_v3   ;;  %v1396_v6 = vand.u32 4294901760, %v102_v5  ;;  %v98_v8 = vld [vmem:[#allocation2 + $0xd0] sm:$0xff]  ;;  %v96_v9 = vld [vmem:[#allocation2 + $0xc0] sm:$0xff]  ;;  %v1398_v10 = vand.u32 4294901760, %v100_v7 }
   0x8   :  { %41 = vperm.xlu0 %1314, %v36_v3   ;;  %52 = vperm.xlu2 %1318, %v37_v4   ;;  %v1400_v11 = vand.u32 4294901760, %v98_v8  ;;  %v1402_v12 = vand.u32 4294901760, %v96_v9  ;;  %v94_v13 = vld [vmem:[#allocation2 + $0xb0] sm:$0xff]  ;;  %v92_v14 = vld [vmem:[#allocation2 + $0xa0] sm:$0xff] }
   0x9   :  { %v90_v15 = vld [vmem:[#allocation2 + $0x90] sm:$0xff]  ;;  %v1405_v16 = vsub.f32 %v102_v5, %v1396_v6  ;;  %324 = vmatpush.msra.mxu3 %v1396_v6  ;;  %v1408_v17 = vand.u32 4294901760, %v94_v13  ;;  %111 = vmatpush.msra.mxu0 %v1396_v6  ;;  %v1411_v18 = vand.u32 4294901760, %v92_v14  ;;  %v88_v20 = vld [vmem:[#allocation2 + $0x80] sm:$0xff]  ;;  %v1416_v21 = vsub.f32 %v100_v7, %v1398_v10 }
   0xa   :  { %v1413_v19 = vand.u32 4294901760, %v90_v15  ;;  %v1419_v22 = vsub.f32 %v98_v8, %v1400_v11  ;;  %v1422_v23 = vsub.f32 %v96_v9, %v1402_v12  ;;  %v1424_v24 = vand.u32 4294901760, %v88_v20  ;;  %v86_v37 = vld [vmem:[#allocation2 + $0x70] sm:$0xff]  ;;  %v84_v41 = vld [vmem:[#allocation2 + $0x60] sm:$0xff] }
   0xb   :  { %v161_v25 = vand.u32 4294901760, %v1405_v16  ;;  %266 = vmatpush.msra.mxu2 %v1405_v16  ;;  %326 = vmatpush.msra.mxu3 %v1398_v10  ;;  %v1430_v26 = vsub.f32 %v94_v13, %v1408_v17  ;;  %v1433_v27 = vsub.f32 %v92_v14, %v1411_v18  ;;  %v167_v28 = vand.u32 4294901760, %v1416_v21  ;;  %v82_v42 = vld [vmem:[#allocation2 + $0x50] sm:$0xff]  ;;  %v80_v44 = vld [vmem:[#allocation2 + $0x40] sm:$0xff]  ;;  %v103_v14 = vld [vmem:[#allocation2 + $0xf8] sm:$0xff] }
   0xc   :  { %v173_v29 = vand.u32 4294901760, %v1419_v22  ;;  %v179_v30 = vand.u32 4294901760, %v1422_v23  ;;  %113 = vmatpush.msra.mxu0 %v1398_v10  ;;  %v1446_v33 = vsub.f32 %v90_v15, %v1413_v19  ;;  %v1456_v36 = vsub.f32 %v88_v20, %v1424_v24  ;;  %v78_v49 = vld [vmem:[#allocation2 + $0x30] sm:$0xff]  ;;  %v76_v59 = vld [vmem:[#allocation2 + $0x20] sm:$0xff] }
   0xd   :  { %v162_v31 = vsub.f32 %v1405_v16, %v161_v25  ;;  %269 = vmatpush.msra.mxu2 %v1416_v21  ;;  %v2242_v32 = vand.u32 4294901760, %v1430_v26  ;;  %328 = vmatpush.msra.mxu3 %v1400_v11  ;;  %v168_v34 = vsub.f32 %v1416_v21, %v167_v28  ;;  %v2239_v40 = vand.u32 4294901760, %v1433_v27  ;;  %v72_v8 = vld [vmem:[#allocation2] sm:$0xff] }
   0xe   :  { %v174_v35 = vsub.f32 %v1419_v22, %v173_v29  ;;  %115 = vmatpush.msra.mxu0 %v1400_v11  ;;  %v180_v39 = vsub.f32 %v1422_v23, %v179_v30  ;;  %v2236_v47 = vand.u32 4294901760, %v1446_v33  ;;  %v1467_v48 = vand.u32 4294901760, %v86_v37 }
   0xf   :  { %1317 = vset.pattern.permute.xlu1 %v1352_v1  ;;  %v163_v38 = vand.u32 4294901760, %v162_v31  ;;  %v169_v43 = vand.u32 4294901760, %v168_v34  ;;  %v186_v46 = vsub.f32 %v1430_v26, %v2242_v32  ;;  %272 = vmatpush.msra.mxu2 %v1419_v22  ;;  %v2234_v50 = vand.u32 4294901760, %v1456_v36  ;;  %v74_v1 = vld [vmem:[#allocation2 + $0x10] sm:$0xff]  ;;  %v101_v34 = vld [vmem:[#allocation2 + $0xe8] sm:$0xff] }
  0x10   :  { %1315 = vset.pattern.permute.xlu0 %v1353_v2  ;;  %44 = vperm.xlu1 %1317, %v37_v4   ;;  %v175_v45 = vand.u32 4294901760, %v174_v35  ;;  %v1471_v51 = vand.u32 4294901760, %v84_v41  ;;  %v1473_v52 = vand.u32 4294901760, %v82_v42  ;;  %v181_v53 = vand.u32 4294901760, %v180_v39 }
  0x11   :  { %49 = vperm.xlu0 %1315, %v36_v3   ;;  %1319 = vset.pattern.permute.xlu2 %v2237_v0  ;;  %v192_v54 = vsub.f32 %v1433_v27, %v2239_v40  ;;  %v1480_v55 = vsub.f32 %v86_v37, %v1467_v48  ;;  %v1482_v56 = vand.u32 4294901760, %v80_v44  ;;  %v1489_v58 = vand.u32 4294901760, %v78_v49 }
  0x12   :  { %164 = vmatpush.msra.mxu1 %v163_v38  ;;  %62 = vperm.xlu2 %1319, %v37_v4   ;;  %v1487_v57 = vsub.f32 %v84_v41, %v1471_v51  ;;  %v187_v60 = vand.u32 4294901760, %v186_v46  ;;  %v198_v61 = vsub.f32 %v1446_v33, %v2236_v47  ;;  %v1497_v63 = vsub.f32 %v82_v42, %v1473_v52  ;;  %v99_v38 = vld [vmem:[#allocation2 + $0xd8] sm:$0xff] }
  0x13   :  { %330 = vmatpush.msra.mxu3 %v1402_v12  ;;  %275 = vmatpush.msra.mxu2 %v1422_v23  ;;  %v2233_v62 = vand.u32 4294901760, %v1480_v55  ;;  %v204_v2 = vsub.f32 %v1456_v36, %v2234_v50  ;;  %v193_v3 = vand.u32 4294901760, %v192_v54  ;;  %v1507_v5 = vsub.f32 %v80_v44, %v1482_v56 }
  0x14   :  { %170 = vmatpush.msra.mxu1 %v169_v43  ;;  %117 = vmatpush.msra.mxu0 %v1402_v12  ;;  %v2232_v4 = vand.u32 4294901760, %v1487_v57  ;;  %v1509_v7 = vand.u32 4294901760, %v76_v59  ;;  %v1514_v9 = vsub.f32 %v78_v49, %v1489_v58  ;;  %v1516_v13 = vand.u32 4294901760, %v74_v1  ;;  %v97_v49 = vld [vmem:[#allocation2 + $0xc8] sm:$0xff] }
  0x15   :  { %332 = vmatpush.msra.mxu3 %v1408_v17  ;;  %278 = vmatpush.msra.mxu2 %v1430_v26  ;;  %v199_v15 = vand.u32 4294901760, %v198_v61  ;;  %v210_v20 = vsub.f32 %v1480_v55, %v2233_v62  ;;  %v2231_v31 = vand.u32 4294901760, %v1497_v63  ;;  %v205_v35 = vand.u32 4294901760, %v204_v2  ;;  %v95_v2 = vld [vmem:[#allocation2 + $0xb8] sm:$0xff] }
  0x16   :  { %176 = vmatpush.msra.mxu1 %v175_v45  ;;  %119 = vmatpush.msra.mxu0 %v1408_v17  ;;  %v1525_v37 = vand.u32 4294901760, %v72_v8  ;;  %v216_v39 = vsub.f32 %v1487_v57, %v2232_v4  ;;  %v2230_v41 = vand.u32 4294901760, %v1507_v5  ;;  %v1533_v42 = vsub.f32 %v76_v59, %v1509_v7 }
  0x17   :  { %334 = vmatpush.msra.mxu3 %v1411_v18  ;;  %281 = vmatpush.msra.mxu2 %v1433_v27  ;;  %v1535_v43 = vand.u32 4294901760, %v103_v14  ;;  %v2235_v44 = vand.u32 4294901760, %v1514_v9  ;;  %v1541_v45 = vsub.f32 %v74_v1, %v1516_v13  ;;  %v1543_v46 = vand.u32 4294901760, %v101_v34 }
  0x18   :  { %182 = vmatpush.msra.mxu1 %v181_v53  ;;  %121 = vmatpush.msra.mxu0 %v1411_v18  ;;  %v211_v53 = vand.u32 4294901760, %v210_v20  ;;  %v222_v54 = vsub.f32 %v1497_v63, %v2231_v31  ;;  %v1557_v61 = vsub.f32 %v72_v8, %v1525_v37  ;;  %v1567_v20 = vand.u32 4294901760, %v97_v49 }
  0x19   :  { %336 = vmatpush.msra.mxu3 %v1413_v19  ;;  %284 = vmatpush.msra.mxu2 %v1446_v33  ;;  %v1550_v59 = vsub.f32 %v103_v14, %v1535_v43  ;;  %v1560_v1 = vsub.f32 %v101_v34, %v1543_v46  ;;  %v228_v14 = vsub.f32 %v1507_v5, %v2230_v41  ;;  %v2240_v8 = vand.u32 4294901760, %v1541_v45 }
  0x1a   :  { %188 = vmatpush.msra.mxu1 %v187_v60  ;;  %123 = vmatpush.msra.mxu0 %v1413_v19  ;;  %v1552_v60 = vand.u32 4294901760, %v99_v38  ;;  %v234_v41 = vsub.f32 %v1514_v9, %v2235_v44  ;;  %v1580_v4 = vand.u32 4294901760, %v95_v2  ;;  %v2244_v62 = vand.u32 4294901760, %v1557_v61 }
  0x1b   :  { %338 = vmatpush.msra.mxu3 %v1424_v24  ;;  %287 = vmatpush.msra.mxu2 %v1456_v36  ;;  %v2241_v34 = vand.u32 4294901760, %v1550_v59  ;;  %v229_v50 = vand.u32 4294901760, %v228_v14  ;;  %v246_v0 = vsub.f32 %v1541_v45, %v2240_v8  ;;  %v2247_v22 = vmov 2  }
  0x1c   :  { %194 = vmatpush.msra.mxu1 %v193_v3  ;;  %125 = vmatpush.msra.mxu0 %v1424_v24  ;;  %v217_v3 = vand.u32 4294901760, %v216_v39  ;;  %v223_v39 = vand.u32 4294901760, %v222_v54  ;;  %v1578_v31 = vsub.f32 %v99_v38, %v1552_v60  ;;  %v91_v54 = vld [vmem:[#allocation2 + $0x98] sm:$0xff]  ;;  %v1591_v38 = vsub.f32 %v97_v49, %v1567_v20 }
  0x1d   :  { %340 = vmatpush.msra.mxu3 %v1467_v48  ;;  %290 = vmatpush.msra.mxu2 %v1480_v55  ;;  %v235_v14 = vand.u32 4294901760, %v234_v41  ;;  %v1608_v40 = vand.u32 4294901760, %v91_v54  ;;  %v252_v41 = vsub.f32 %v1557_v61, %v2244_v62  ;;  %v2249_v23 = vand.u32 4294901760, %v1456_v36 }
  0x1e   :  { %200 = vmatpush.msra.mxu1 %v199_v15  ;;  %127 = vmatpush.msra.mxu0 %v1467_v48  ;;  %v2238_v15 = vand.u32 4294901760, %v1533_v42  ;;  %v545_v49 = vand.u32 4294901760, %v1578_v31 }
  0x1f   :  { %342 = vmatpush.msra.mxu3 %v1471_v51  ;;  %293 = vmatpush.msra.mxu2 %v1487_v57  ;;  %v1631_v62 = vsub.f32 %v91_v54, %v1608_v40 }
  0x20   :  { %206 = vmatpush.msra.mxu1 %v205_v35  ;;  %129 = vmatpush.msra.mxu0 %v1471_v51  ;;  %v93_v35 = vld [vmem:[#allocation2 + $0xa8] sm:$0xff]  ;;  %v240_v44 = vsub.f32 %v1533_v42, %v2238_v15  ;;  %v1606_v15 = vsub.f32 %v95_v2, %v1580_v4  ;;  %v551_v2 = vand.u32 4294901760, %v1591_v38 }
  0x21   :  { %344 = vmatpush.msra.mxu3 %v1473_v52  ;;  %296 = vmatpush.msra.mxu2 %v1497_v63  ;;  %v1593_v47 = vand.u32 4294901760, %v93_v35 }
  0x22   :  { %212 = vmatpush.msra.mxu1 %v211_v53  ;;  %131 = vmatpush.msra.mxu0 %v1473_v52  ;;  %v2243_v53 = vand.u32 4294901760, %v1560_v1 }
  0x23   :  { %346 = vmatpush.msra.mxu3 %v1482_v56  ;;  %299 = vmatpush.msra.mxu2 %v1507_v5 }
  0x24   :  { %218 = vmatpush.msra.mxu1 %v217_v3  ;;  %133 = vmatpush.msra.mxu0 %v1482_v56  ;;  %v534_v3 = vsub.f32 %v1550_v59, %v2241_v34  ;;  %v540_v8 = vsub.f32 %v1560_v1, %v2243_v53  ;;  %v1621_v34 = vsub.f32 %v93_v35, %v1593_v47  ;;  %v247_v53 = vand.u32 4294901760, %v246_v0 }
  0x25   :  { %348 = vmatpush.msra.mxu3 %v1489_v58  ;;  %302 = vmatpush.msra.mxu2 %v1514_v9  ;;  %v552_v0 = vsub.f32 %v1591_v38, %v551_v2 }
  0x26   :  { %224 = vmatpush.msra.mxu1 %v223_v39  ;;  %135 = vmatpush.msra.mxu0 %v1489_v58  ;;  %v241_v39 = vand.u32 4294901760, %v240_v44  ;;  %v535_v32 = vand.u32 4294901760, %v534_v3  ;;  %v557_v44 = vand.u32 4294901760, %v1606_v15  ;;  %v541_v35 = vand.u32 4294901760, %v540_v8 }
  0x27   :  { %350 = vmatpush.msra.mxu3 %v1509_v7  ;;  %305 = vmatpush.msra.mxu2 %v1533_v42  ;;  %v253_v3 = vand.u32 4294901760, %v252_v41  ;;  %v553_v41 = vand.u32 4294901760, %v552_v0 }
  0x28   :  { %230 = vmatpush.msra.mxu1 %v229_v50  ;;  %137 = vmatpush.msra.mxu0 %v1509_v7  ;;  %v546_v50 = vsub.f32 %v1578_v31, %v545_v49  ;;  %v558_v8 = vsub.f32 %v1606_v15, %v557_v44 }
  0x29   :  { %352 = vmatpush.msra.mxu3 %v1516_v13  ;;  %308 = vmatpush.msra.mxu2 %v1541_v45 }
  0x2a   :  { %236 = vmatpush.msra.mxu1 %v235_v14  ;;  %139 = vmatpush.msra.mxu0 %v1516_v13  ;;  %v563_v14 = vand.u32 4294901760, %v1621_v34  ;;  %v547_v54 = vand.u32 4294901760, %v546_v50 }
  0x2b   :  { %354 = vmatpush.msra.mxu3 %v1525_v37  ;;  %311 = vmatpush.msra.mxu2 %v1557_v61 }
  0x2c   :  { %242 = vmatpush.msra.mxu1 %v241_v39  ;;  %v569_v39 = vand.u32 4294901760, %v1631_v62  ;;  %141 = vmatpush.msra.mxu0 %v1525_v37 }
  0x2d   :  { %536 = vmatpush.msrb.mxu3 %v535_v32  ;;  %483 = vmatpush.msrb.mxu2 %v1535_v43  ;;  %v564_v32 = vsub.f32 %v1621_v34, %v563_v14 }
  0x2e   :  { %248 = vmatpush.msra.mxu1 %v247_v53  ;;  %371 = vmatpush.msrb.mxu0 %v161_v25  ;;  %v559_v53 = vand.u32 4294901760, %v558_v8  ;;  %v570_v50 = vsub.f32 %v1631_v62, %v569_v39  ;;  %v2251_v25 = vand.u32 4294901760, %v1487_v57 }
  0x2f   :  { %542 = vmatpush.msrb.mxu3 %v541_v35  ;;  %485 = vmatpush.msrb.mxu2 %v1543_v46 }
  0x30   :  { %254 = vmatpush.msra.mxu1 %v253_v3  ;;  %375 = vmatpush.msrb.mxu0 %v167_v28  ;;  %v571_v16 = vand.u32 4294901760, %v570_v50  ;;  %v2256_v28 = vand.u32 4294901760, %v1541_v45  ;;  %v79_v3 = vld [vmem:[#allocation2 + $0x38] sm:$0xff]  ;;  %v77_v50 = vld [vmem:[#allocation2 + $0x28] sm:$0xff] }
  0x31   :  { %487 = vmatpush.msrb.mxu2 %v1552_v60  ;;  %548 = vmatpush.msrb.mxu3 %v547_v54  ;;  %v1748_v54 = vand.u32 4294901760, %v79_v3 }
  0x32   :  { %442 = vmatpush.msrb.mxu1 %v1396_v6  ;;  %v565_v6 = vand.u32 4294901760, %v564_v32  ;;  %379 = vmatpush.msrb.mxu0 %v173_v29  ;;  %v2257_v29 = vand.u32 4294901760, %v1557_v61 }
  0x33   :  { %489 = vmatpush.msrb.mxu2 %v1567_v20  ;;  %554 = vmatpush.msrb.mxu3 %v553_v41 }
  0x34   :  { %444 = vmatpush.msrb.mxu1 %v1398_v10  ;;  %383 = vmatpush.msrb.mxu0 %v179_v30  ;;  %v89_v10 = vld [vmem:[#allocation2 + $0x88] sm:$0xff]  ;;  %v87_v30 = vld [vmem:[#allocation2 + $0x78] sm:$0xff] }
  0x35   :  { %491 = vmatpush.msrb.mxu2 %v1580_v4  ;;  %560 = vmatpush.msrb.mxu3 %v559_v53  ;;  %v1674_v21 = vand.u32 4294901760, %v89_v10 }
  0x36   :  { %446 = vmatpush.msrb.mxu1 %v1400_v11  ;;  %v2245_v11 = vand.u32 4294901760, %v1430_v26  ;;  %1320 = vset.pattern.permute.xlu0 %v2247_v22  ;;  %v2254_v26 = vand.u32 4294901760, %v1514_v9 }
  0x37   :  { %493 = vmatpush.msrb.mxu2 %v1593_v47  ;;  %566 = vmatpush.msrb.mxu3 %v565_v6  ;;  %v1714_v36 = vsub.f32 %v89_v10, %v1674_v21  ;;  %v1758_v6 = vand.u32 4294901760, %v77_v50 }
  0x38   :  { %448 = vmatpush.msrb.mxu1 %v1402_v12  ;;  %387 = vmatpush.msrb.mxu0 %v2245_v11  ;;  %v2246_v12 = vand.u32 4294901760, %v1433_v27  ;;  %v2255_v27 = vand.u32 4294901760, %v1533_v42 }
  0x39   :  { %495 = vmatpush.msrb.mxu2 %v1608_v40  ;;  %572 = vmatpush.msrb.mxu3 %v571_v16  ;;  %v1761_v16 = vsub.f32 %v79_v3, %v1748_v54 }
  0x3a   :  { %450 = vmatpush.msrb.mxu1 %v1408_v17  ;;  %391 = vmatpush.msrb.mxu0 %v2246_v12  ;;  %v2248_v17 = vand.u32 4294901760, %v1446_v33  ;;  %v1711_v33 = vand.u32 4294901760, %v87_v30  ;;  %v75_v12 = vld [vmem:[#allocation2 + $0x18] sm:$0xff] }
  0x3b   :  { %497 = vmatpush.msrb.mxu2 %v1674_v21  ;;  %v605_v22 = vand.u32 4294901760, %v1761_v16 }
  0x3c   :  { %452 = vmatpush.msrb.mxu1 %v1411_v18  ;;  %395 = vmatpush.msrb.mxu0 %v2248_v17  ;;  %v2250_v18 = vand.u32 4294901760, %v1480_v55  ;;  %v1721_v55 = vsub.f32 %v87_v30, %v1711_v33  ;;  %v1768_v17 = vand.u32 4294901760, %v75_v12 }
  0x3d   :  { %499 = vmatpush.msrb.mxu2 %v1711_v33 }
  0x3e   :  { %454 = vmatpush.msrb.mxu1 %v1413_v19  ;;  %399 = vmatpush.msrb.mxu0 %v2249_v23  ;;  %v2252_v19 = vand.u32 4294901760, %v1497_v63  ;;  %v1771_v23 = vsub.f32 %v77_v50, %v1758_v6 }
  0x40   :  { %456 = vmatpush.msrb.mxu1 %v1424_v24  ;;  %403 = vmatpush.msrb.mxu0 %v2250_v18  ;;  %v2253_v24 = vand.u32 4294901760, %v1507_v5 }
  0x42   :  { %458 = vmatpush.msrb.mxu1 %v1467_v48  ;;  %407 = vmatpush.msrb.mxu0 %v2251_v25  ;;  %v85_v48 = vld [vmem:[#allocation2 + $0x68] sm:$0xff] }
  0x43   :  { %v73_v25 = vld [vmem:[#allocation2 + $0x8] sm:$0xff] }
  0x44   :  { %460 = vmatpush.msrb.mxu1 %v1471_v51  ;;  %411 = vmatpush.msrb.mxu0 %v2252_v19  ;;  %v575_v51 = vand.u32 4294901760, %v1714_v36  ;;  %v606_v19 = vsub.f32 %v1761_v16, %v605_v22 }
  0x46   :  { %462 = vmatpush.msrb.mxu1 %v1473_v52  ;;  %415 = vmatpush.msrb.mxu0 %v2253_v24  ;;  %v1718_v52 = vand.u32 4294901760, %v85_v48  ;;  %v576_v57 = vsub.f32 %v1714_v36, %v575_v51  ;;  %v611_v24 = vand.u32 4294901760, %v1771_v23 }
  0x48   :  { %464 = vmatpush.msrb.mxu1 %v1482_v56  ;;  %419 = vmatpush.msrb.mxu0 %v2254_v26  ;;  %v83_v56 = vld [vmem:[#allocation2 + $0x58] sm:$0xff]  ;;  %v1731_v5 = vsub.f32 %v85_v48, %v1718_v52  ;;  %v577_v9 = vand.u32 4294901760, %v576_v57  ;;  %v1778_v26 = vand.u32 4294901760, %v73_v25 }
  0x49   :  { %501 = vmatpush.msrb.mxu2 %v1718_v52  ;;  %v1728_v63 = vand.u32 4294901760, %v83_v56 }
  0x4a   :  { %466 = vmatpush.msrb.mxu1 %v1489_v58  ;;  %423 = vmatpush.msrb.mxu0 %v2255_v27  ;;  %v581_v58 = vand.u32 4294901760, %v1721_v55  ;;  %v1781_v27 = vsub.f32 %v75_v12, %v1768_v17  ;;  %v1788_v30 = vsub.f32 %v73_v25, %v1778_v26 }
  0x4b   :  { %503 = vmatpush.msrb.mxu2 %v1728_v63  ;;  %v1741_v45 = vsub.f32 %v83_v56, %v1728_v63  ;;  %578 = vmatpush.msrb.mxu3 %v577_v9 }
  0x4c   :  { %468 = vmatpush.msrb.mxu1 %v1509_v7  ;;  %427 = vmatpush.msrb.mxu0 %v2256_v28  ;;  %v81_v7 = vld [vmem:[#allocation2 + $0x48] sm:$0xff]  ;;  %v607_v28 = vand.u32 4294901760, %v606_v19  ;;  %v617_v48 = vand.u32 4294901760, %v1781_v27  ;;  %v623_v57 = vand.u32 4294901760, %v1788_v30  ;;  %v1354_v19 = vmov 1.0  }
  0x4d   :  { %v1738_v42 = vand.u32 4294901760, %v81_v7  ;;  %v593_v0 = vand.u32 4294901760, %v1741_v45 }
  0x4e   :  { %470 = vmatpush.msrb.mxu1 %v1516_v13  ;;  %431 = vmatpush.msrb.mxu0 %v2257_v29  ;;  %v582_v13 = vsub.f32 %v1721_v55, %v581_v58  ;;  %v612_v29 = vsub.f32 %v1771_v23, %v611_v24  ;;  %v624_v9 = vsub.f32 %v1788_v30, %v623_v57 }
  0x4f   :  { %505 = vmatpush.msrb.mxu2 %v1738_v42  ;;  %v1751_v8 = vsub.f32 %v81_v7, %v1738_v42  ;;  %v594_v32 = vsub.f32 %v1741_v45, %v593_v0  ;;  %v618_v7 = vsub.f32 %v1781_v27, %v617_v48 }
  0x50   :  { %472 = vmatpush.msrb.mxu1 %v1525_v37  ;;  %v587_v37 = vand.u32 4294901760, %v1731_v5  ;;  %v583_v61 = vand.u32 4294901760, %v582_v13  ;;  %v613_v56 = vand.u32 4294901760, %v612_v29 }
  0x51   :  { %507 = vmatpush.msrb.mxu2 %v1748_v54  ;;  %v599_v53 = vand.u32 4294901760, %v1751_v8  ;;  %v595_v10 = vand.u32 4294901760, %v594_v32  ;;  %v619_v13 = vand.u32 4294901760, %v618_v7  ;;  %v38_v32 = vlaneseq }
  0x52   :  { %v588_v35 = vsub.f32 %v1731_v5, %v587_v37  ;;  %584 = vmatpush.msrb.mxu3 %v583_v61  ;;  %v625_v61 = vand.u32 4294901760, %v624_v9 }
  0x53   :  { %v600_v11 = vsub.f32 %v1751_v8, %v599_v53  ;;  %509 = vmatpush.msrb.mxu2 %v1758_v6  ;;  %v39_v50 = vand.u32 127, %v38_v32 }
  0x54   :  { %v589_v41 = vand.u32 4294901760, %v588_v35 }
  0x55   :  { %v601_v18 = vand.u32 4294901760, %v600_v11  ;;  %511 = vmatpush.msrb.mxu2 %v1768_v17 }
  0x56   :  { %590 = vmatpush.msrb.mxu3 %v589_v41 }
  0x57   :  { %513 = vmatpush.msrb.mxu2 %v1778_v26 }
  0x58   :  { %596 = vmatpush.msrb.mxu3 %v595_v10 }
  0x5a   :  { %602 = vmatpush.msrb.mxu3 %v601_v18 }
  0x5c   :  { %608 = vmatpush.msrb.mxu3 %v607_v28  ;;  %v1355_v28 = vmov 0.0  }
  0x5e   :  { %614 = vmatpush.msrb.mxu3 %v613_v56 }
  0x60   :  { %620 = vmatpush.msrb.mxu3 %v619_v13  ;;  %v2262_v13 = vand.u32 4294901760, %v1550_v59 }
  0x62   :  { %626 = vmatpush.msrb.mxu3 %v625_v61  ;;  %v53_v35 = vpop.permute.xlu2 %52 }
  0x63   :  { %vm55_vm0 = vcmp.eq.s32.totalorder %v39_v50, %v53_v35 }
  0x6c   :  { %v63_v10 = vpop.permute.xlu2 %62 }
  0x6d   :  { %vm65_vm5 = vcmp.eq.s32.totalorder %v39_v50, %v63_v10 }
  0x79   :  { %v60_v41 = vpop.permute.xlu1 %59 }
  0x7a   :  { %v42_v3 = vpop.permute.xlu0 %41  ;;  %vm64_vm6 = vcmp.eq.s32.totalorder %v39_v50, %v60_v41 }
  0x7b   :  { %vm46_vm3 = vcmp.eq.s32.totalorder %v39_v50, %v42_v3  ;;  %v2263_v3 = vand.u32 4294901760, %v1560_v1 }
  0x82   :  { %v45_v11 = vpop.permute.xlu1 %44 }
  0x83   :  { %v50_v12 = vpop.permute.xlu0 %49  ;;  %vm47_vm1 = vcmp.eq.s32.totalorder %v39_v50, %v45_v11 }
  0x84   :  { %vm54_vm2 = vcmp.eq.s32.totalorder %v39_v50, %v50_v12  ;;  %vm57_vm4 = vmor %vm47_vm1, %vm55_vm0  ;;  %v866_v50 = vld [vmem:[%s2227_s3 + $0x30] sm:$0xff] }
  0x85   :  { %vm56_vm7 = vmor %vm46_vm3, %vm54_vm2  ;;  %v2044_v25 = vand.u32 4294901760, %v866_v50 }
  0x86   :  { %vm1798_vm8 = vmor %vm56_vm7, %vm64_vm6 }
  0x87   :  { %vm1802_vm9 = vmor %vm57_vm4, %vm65_vm5  ;;  %1262 = vmatmul.msk.f32.vlgmr.msra.gmra.mxu1 %vm1798_vm8, %v1354_v19  ;;  %v1260_v29 = vsel %vm1798_vm8, 1.0, %v1355_v28 }
  0x88   :  { %696 = vmatpush.msra.mxu1 %v1535_v43  ;;  %v1812_v56 = vsub.f32 %v1260_v29, %v1260_v29  ;;  %v1261_v7 = vsel %vm1802_vm9, 1.0, %v1355_v28 }
  0x89   :  { %v1827_v35 = vsub.f32 %v1261_v7, %v1261_v7 }
  0x8a   :  { %314 = vmatmul.f32.vlgmr.msra.gmra.mxu2 %v1812_v56  ;;  %698 = vmatpush.msra.mxu1 %v1543_v46  ;;  %v1819_v9 = vand.u32 4294901760, %v1812_v56 }
  0x8b   :  { %743 = vmatpush.msra.mxu2 %v2262_v13  ;;  %v1840_v32 = vand.u32 4294901760, %v1827_v35  ;;  %v864_v13 = vld [vmem:[%s2227_s3 + $0x20] sm:$0xff] }
  0x8c   :  { %358 = vmatmul.f32.vlgmr.msra.gmra.mxu3 %v1819_v9  ;;  %700 = vmatpush.msra.mxu1 %v1552_v60  ;;  %v145_v61 = vsub.f32 %v1812_v56, %v1819_v9 }
  0x8d   :  { %747 = vmatpush.msra.mxu2 %v2263_v3  ;;  %814 = vmatpush.msra.mxu3 %v1535_v43  ;;  %v153_v43 = vsub.f32 %v1827_v35, %v1840_v32 }
  0x8e   :  { %702 = vmatpush.msra.mxu1 %v1567_v20  ;;  %v146_v41 = vand.u32 4294901760, %v145_v61 }
  0x8f   :  { %1263 = vmatmul.msk.f32.gmra.mxu1 %vm1802_vm9, %v1354_v19  ;;  %751 = vmatpush.msra.mxu2 %v545_v49 }
  0x90   :  { %816 = vmatpush.msra.mxu3 %v1543_v46  ;;  %147 = vmatmul.f32.vlgmr.msra.gmra.mxu0 %v146_v41  ;;  %v154_v46 = vand.u32 4294901760, %v153_v43  ;;  %v863_v43 = vld [vmem:[%s2227_s3 + $0x18] sm:$0xff] }
  0x91   :  { %704 = vmatpush.msra.mxu1 %v1580_v4  ;;  %638 = vmatpush.msra.mxu0 %v1550_v59  ;;  %v873_v59 = vld [vmem:[%s2227_s3 + $0x68] sm:$0xff] }
  0x92   :  { %755 = vmatpush.msra.mxu2 %v551_v2  ;;  %818 = vmatpush.msra.mxu3 %v1552_v60 }
  0x93   :  { %319 = vmatmul.f32.gmra.mxu2 %v1827_v35  ;;  %706 = vmatpush.msra.mxu1 %v1593_v47 }
  0x94   :  { %641 = vmatpush.msra.mxu0 %v1560_v1  ;;  %759 = vmatpush.msra.mxu2 %v557_v44  ;;  %v871_v44 = vld [vmem:[%s2227_s3 + $0x58] sm:$0xff] }
  0x95   :  { %820 = vmatpush.msra.mxu3 %v1567_v20  ;;  %708 = vmatpush.msra.mxu1 %v1608_v40  ;;  %v872_v20 = vld [vmem:[%s2227_s3 + $0x60] sm:$0xff] }
  0x96   :  { %364 = vmatmul.f32.gmra.mxu3 %v1840_v32  ;;  %644 = vmatpush.msra.mxu0 %v1578_v31  ;;  %v1978_v2 = vand.u32 4294901760, %v872_v20 }
  0x97   :  { %763 = vmatpush.msra.mxu2 %v563_v14  ;;  %822 = vmatpush.msra.mxu3 %v1580_v4 }
  0x98   :  { %710 = vmatpush.msra.mxu1 %v1674_v21  ;;  %647 = vmatpush.msra.mxu0 %v1591_v38 }
  0x99   :  { %1266 = vmatmul.msk.f32.vlgmr.msrb.gmra.mxu1 %vm1798_vm8, %v1354_v19  ;;  %767 = vmatpush.msra.mxu2 %v569_v39 }
  0x9a   :  { %824 = vmatpush.msra.mxu3 %v1593_v47  ;;  %155 = vmatmul.f32.gmra.mxu0 %v154_v46 }
  0x9b   :  { %712 = vmatpush.msra.mxu1 %v1711_v33  ;;  %650 = vmatpush.msra.mxu0 %v1606_v15  ;;  %v1967_v15 = vand.u32 4294901760, %v873_v59 }
  0x9c   :  { %771 = vmatpush.msra.mxu2 %v575_v51  ;;  %826 = vmatpush.msra.mxu3 %v1608_v40  ;;  %v875_v40 = vld [vmem:[%s2227_s3 + $0x78] sm:$0xff]  ;;  %v870_v51 = vld [vmem:[%s2227_s3 + $0x50] sm:$0xff] }
  0x9d   :  { %519 = vmatmul.f32.vlgmr.msrb.gmra.mxu2 %v146_v41  ;;  %714 = vmatpush.msra.mxu1 %v1718_v52  ;;  %v1951_v47 = vand.u32 4294901760, %v875_v40  ;;  %v942_v49 = vsub.f32 %v873_v59, %v1967_v15  ;;  %v2062_v41 = vand.u32 4294901760, %v864_v13  ;;  %v2077_v59 = vand.u32 4294901760, %v863_v43 }
  0x9e   :  { %653 = vmatpush.msra.mxu0 %v1621_v34  ;;  %775 = vmatpush.msra.mxu2 %v581_v58 }
  0x9f   :  { %828 = vmatpush.msra.mxu3 %v1674_v21  ;;  %716 = vmatpush.msra.mxu1 %v1728_v63  ;;  %v930_v4 = vsub.f32 %v875_v40, %v1951_v47  ;;  %v1986_v21 = vand.u32 4294901760, %v942_v49 }
  0xa0   :  { %1268 = vmatmul.msk.f32.vlgmr.msrb.gmra.mxu3 %vm1798_vm8, %v1354_v19  ;;  %656 = vmatpush.msra.mxu0 %v1631_v62  ;;  %v874_v62 = vld [vmem:[%s2227_s3 + $0x70] sm:$0xff] }
  0xa1   :  { %779 = vmatpush.msra.mxu2 %v587_v37  ;;  %830 = vmatpush.msra.mxu3 %v1711_v33  ;;  %v1957_v31 = vand.u32 4294901760, %v874_v62  ;;  %v1964_v60 = vand.u32 4294901760, %v930_v4  ;;  %v948_v33 = vsub.f32 %v872_v20, %v1978_v2  ;;  %v869_v37 = vld [vmem:[%s2227_s3 + $0x48] sm:$0xff] }
  0xa2   :  { %718 = vmatpush.msra.mxu1 %v1738_v42  ;;  %659 = vmatpush.msra.mxu0 %v1714_v36  ;;  %v1990_v36 = vand.u32 4294901760, %v871_v44 }
  0xa3   :  { %1267 = vmatmul.msk.f32.gmra.mxu1 %vm1802_vm9, %v1354_v19  ;;  %783 = vmatpush.msra.mxu2 %v593_v0  ;;  %v936_v1 = vsub.f32 %v874_v62, %v1957_v31  ;;  %v932_v34 = vsub.f32 %v930_v4, %v1964_v60  ;;  %v1997_v58 = vand.u32 4294901760, %v948_v33  ;;  %v996_v62 = vsub.f32 %v864_v13, %v2062_v41 }
  0xa4   :  { %832 = vmatpush.msra.mxu3 %v1718_v52  ;;  %1264 = vmatmul.msk.f32.vlgmr.msrb.gmra.mxu0 %vm1798_vm8, %v1354_v19 }
  0xa5   :  { %720 = vmatpush.msra.mxu1 %v1748_v54  ;;  %662 = vmatpush.msra.mxu0 %v1721_v55  ;;  %v1975_v38 = vand.u32 4294901760, %v936_v1  ;;  %v933_v14 = vand.u32 4294901760, %v932_v34  ;;  %v944_v55 = vsub.f32 %v942_v49, %v1986_v21  ;;  %v2083_v34 = vand.u32 4294901760, %v996_v62 }
  0xa6   :  { %787 = vmatpush.msra.mxu2 %v599_v53  ;;  %834 = vmatpush.msra.mxu3 %v1728_v63  ;;  %v1999_v63 = vand.u32 4294901760, %v870_v51  ;;  %v868_v53 = vld [vmem:[%s2227_s3 + $0x40] sm:$0xff] }
  0xa7   :  { %527 = vmatmul.f32.gmra.mxu2 %v154_v46  ;;  %722 = vmatpush.msra.mxu1 %v1758_v6  ;;  %v938_v39 = vsub.f32 %v936_v1, %v1975_v38 }
  0xa8   :  { %665 = vmatpush.msra.mxu0 %v1731_v5  ;;  %791 = vmatpush.msra.mxu2 %v605_v22  ;;  %v954_v5 = vsub.f32 %v871_v44, %v1990_v36  ;;  %v960_v0 = vsub.f32 %v870_v51, %v1999_v63  ;;  %v998_v51 = vsub.f32 %v996_v62, %v2083_v34 }
  0xa9   :  { %836 = vmatpush.msra.mxu3 %v1738_v42  ;;  %724 = vmatpush.msra.mxu1 %v1768_v17  ;;  %v939_v52 = vand.u32 4294901760, %v938_v39  ;;  %v945_v42 = vand.u32 4294901760, %v944_v55  ;;  %v861_v39 = vld [vmem:[%s2227_s3 + $0x8] sm:$0xff] }
  0xaa   :  { %1269 = vmatmul.msk.f32.gmra.mxu3 %vm1802_vm9, %v1354_v19  ;;  %668 = vmatpush.msra.mxu0 %v1741_v45  ;;  %v950_v45 = vsub.f32 %v948_v33, %v1997_v58  ;;  %v2095_v55 = vand.u32 4294901760, %v861_v39 }
  0xab   :  { %795 = vmatpush.msra.mxu2 %v611_v24  ;;  %838 = vmatpush.msra.mxu3 %v1748_v54  ;;  %v2009_v54 = vand.u32 4294901760, %v869_v37  ;;  %v867_v24 = vld [vmem:[%s2227_s3 + $0x38] sm:$0xff] }
  0xac   :  { %726 = vmatpush.msra.mxu1 %v1778_v26  ;;  %671 = vmatpush.msra.mxu0 %v1751_v8  ;;  %v2011_v8 = vand.u32 4294901760, %v954_v5 }
  0xad   :  { %730 = vmatmul.f32.vlgmr.msra.gmra.mxu1 %v1819_v9  ;;  %799 = vmatpush.msra.mxu2 %v617_v48  ;;  %v966_v22 = vsub.f32 %v869_v37, %v2009_v54  ;;  %v2032_v48 = vand.u32 4294901760, %v867_v24  ;;  %v984_v9 = vsub.f32 %v866_v50, %v2044_v25  ;;  %v860_v37 = vld [vmem:[%s2227_s3] sm:$0xff] }
  0xae   :  { %840 = vmatpush.msra.mxu3 %v1758_v6  ;;  %1265 = vmatmul.msk.f32.gmra.mxu0 %vm1802_vm9, %v1354_v19  ;;  %v951_v6 = vand.u32 4294901760, %v950_v45 }
  0xaf   :  { %674 = vmatpush.msra.mxu0 %v1761_v16  ;;  %803 = vmatpush.msra.mxu2 %v623_v57  ;;  %v2017_v16 = vand.u32 4294901760, %v960_v0  ;;  %v978_v18 = vsub.f32 %v867_v24, %v2032_v48 }
  0xb0   :  { %842 = vmatpush.msra.mxu3 %v1768_v17  ;;  %1270 = vmatmul.msk.f32.vlgmr.msra.gmra.mxu2 %vm1798_vm8, %v1354_v19  ;;  %v2020_v17 = vand.u32 4294901760, %v868_v53 }
  0xb1   :  { %677 = vmatpush.msra.mxu0 %v1771_v23  ;;  %1036 = vmatpush.msrb.mxu2 %v930_v4  ;;  %v956_v23 = vsub.f32 %v954_v5, %v2011_v8 }
  0xb2   :  { %844 = vmatpush.msra.mxu3 %v1778_v26  ;;  %934 = vmatpush.msrb.mxu1 %v933_v14  ;;  %v962_v26 = vsub.f32 %v960_v0, %v2017_v16  ;;  %v1002_v14 = vsub.f32 %v863_v43, %v2077_v59 }
  0xb3   :  { %1272 = vmatmul.msk.f32.vlgmr.msra.gmra.mxu3 %vm1798_vm8, %v1354_v19  ;;  %680 = vmatpush.msra.mxu0 %v1781_v27  ;;  %v2029_v27 = vand.u32 4294901760, %v966_v22  ;;  %v957_v57 = vand.u32 4294901760, %v956_v23 }
  0xb4   :  { %1094 = vmatpush.msrb.mxu3 %v1951_v47  ;;  %1039 = vmatpush.msrb.mxu2 %v936_v1  ;;  %v963_v10 = vand.u32 4294901760, %v962_v26  ;;  %v862_v1 = vld [vmem:[%s2227_s3 + $0x10] sm:$0xff] }
  0xb5   :  { %683 = vmatpush.msra.mxu0 %v1788_v30  ;;  %736 = vmatmul.f32.gmra.mxu1 %v1840_v32  ;;  %v972_v30 = vsub.f32 %v868_v53, %v2020_v17  ;;  %v968_v11 = vsub.f32 %v966_v22, %v2029_v27  ;;  %v2066_v32 = vand.u32 4294901760, %v984_v9  ;;  %v2107_v53 = vand.u32 4294901760, %v860_v37 }
  0xb6   :  { %686 = vmatmul.f32.vlgmr.msra.gmra.mxu0 %v1812_v56  ;;  %1096 = vmatpush.msrb.mxu3 %v1957_v31  ;;  %v2050_v56 = vand.u32 4294901760, %v978_v18 }
  0xb7   :  { %881 = vmatpush.msrb.mxu0 %v1951_v47  ;;  %1042 = vmatpush.msrb.mxu2 %v942_v49  ;;  %v2040_v12 = vand.u32 4294901760, %v972_v30  ;;  %v969_v28 = vand.u32 4294901760, %v968_v11  ;;  %v986_v4 = vsub.f32 %v984_v9, %v2066_v32  ;;  %v2085_v49 = vand.u32 4294901760, %v862_v1 }
  0xb8   :  { %1271 = vmatmul.msk.f32.gmra.mxu2 %vm1802_vm9, %v1354_v19  ;;  %1098 = vmatpush.msrb.mxu3 %v1967_v15  ;;  %v1020_v26 = vsub.f32 %v860_v37, %v2107_v53 }
  0xb9   :  { %883 = vmatpush.msrb.mxu0 %v1957_v31  ;;  %1045 = vmatpush.msrb.mxu2 %v948_v33  ;;  %v974_v29 = vsub.f32 %v972_v30, %v2040_v12  ;;  %v987_v44 = vand.u32 4294901760, %v986_v4 }
  0xba   :  { %1100 = vmatpush.msrb.mxu3 %v1978_v2  ;;  %940 = vmatpush.msrb.mxu1 %v939_v52  ;;  %v1008_v52 = vsub.f32 %v862_v1, %v2085_v49 }
  0xbb   :  { %1273 = vmatmul.msk.f32.gmra.mxu3 %vm1802_vm9, %v1354_v19  ;;  %885 = vmatpush.msrb.mxu0 %v1967_v15  ;;  %v865_v19 = vld [vmem:[%s2227_s3 + $0x28] sm:$0xff]  ;;  %v975_v61 = vand.u32 4294901760, %v974_v29 }
  0xbc   :  { %1102 = vmatpush.msrb.mxu3 %v1990_v36  ;;  %1048 = vmatpush.msrb.mxu2 %v954_v5  ;;  %v2052_v7 = vand.u32 4294901760, %v865_v19  ;;  %v2099_v5 = vand.u32 4294901760, %v1002_v14  ;;  %v2104_v45 = vand.u32 4294901760, %v1008_v52 }
  0xbd   :  { %887 = vmatpush.msrb.mxu0 %v1978_v2  ;;  %946 = vmatpush.msrb.mxu1 %v945_v42  ;;  %v999_v42 = vand.u32 4294901760, %v998_v51 }
  0xbe   :  { %691 = vmatmul.f32.gmra.mxu0 %v1827_v35  ;;  %1104 = vmatpush.msrb.mxu3 %v1999_v63  ;;  %v980_v35 = vsub.f32 %v978_v18, %v2050_v56  ;;  %v990_v3 = vsub.f32 %v865_v19, %v2052_v7  ;;  %v1010_v23 = vsub.f32 %v1008_v52, %v2104_v45 }
  0xbf   :  { %889 = vmatpush.msrb.mxu0 %v1990_v36  ;;  %1051 = vmatpush.msrb.mxu2 %v960_v0  ;;  %v1014_v0 = vsub.f32 %v861_v39, %v2095_v55 }
  0xc0   :  { %1106 = vmatpush.msrb.mxu3 %v2009_v54  ;;  %952 = vmatpush.msrb.mxu1 %v951_v6  ;;  %v981_v46 = vand.u32 4294901760, %v980_v35  ;;  %v2071_v40 = vand.u32 4294901760, %v990_v3  ;;  %v1004_v6 = vsub.f32 %v1002_v14, %v2099_v5 }
  0xc1   :  { %891 = vmatpush.msrb.mxu0 %v1999_v63  ;;  %1054 = vmatpush.msrb.mxu2 %v966_v22  ;;  %v2115_v24 = vand.u32 4294901760, %v1014_v0 }
  0xc2   :  { %1108 = vmatpush.msrb.mxu3 %v2020_v17  ;;  %958 = vmatpush.msrb.mxu1 %v957_v57  ;;  %v992_v20 = vsub.f32 %v990_v3, %v2071_v40 }
  0xc3   :  { %893 = vmatpush.msrb.mxu0 %v2009_v54  ;;  %1057 = vmatpush.msrb.mxu2 %v972_v30  ;;  %v1005_v30 = vand.u32 4294901760, %v1004_v6  ;;  %v1016_v11 = vsub.f32 %v1014_v0, %v2115_v24 }
  0xc4   :  { %1110 = vmatpush.msrb.mxu3 %v2032_v48  ;;  %964 = vmatpush.msrb.mxu1 %v963_v10  ;;  %v993_v33 = vand.u32 4294901760, %v992_v20  ;;  %v1011_v10 = vand.u32 4294901760, %v1010_v23 }
  0xc5   :  { %895 = vmatpush.msrb.mxu0 %v2020_v17  ;;  %1060 = vmatpush.msrb.mxu2 %v978_v18  ;;  %v2125_v18 = vand.u32 4294901760, %v1020_v26 }
  0xc6   :  { %1112 = vmatpush.msrb.mxu3 %v2044_v25  ;;  %970 = vmatpush.msrb.mxu1 %v969_v28  ;;  %v1017_v28 = vand.u32 4294901760, %v1016_v11 }
  0xc7   :  { %897 = vmatpush.msrb.mxu0 %v2032_v48  ;;  %1063 = vmatpush.msrb.mxu2 %v984_v9  ;;  %v1022_v29 = vsub.f32 %v1020_v26, %v2125_v18 }
  0xc8   :  { %1114 = vmatpush.msrb.mxu3 %v2052_v7  ;;  %976 = vmatpush.msrb.mxu1 %v975_v61 }
  0xc9   :  { %899 = vmatpush.msrb.mxu0 %v2044_v25  ;;  %1066 = vmatpush.msrb.mxu2 %v990_v3  ;;  %v1023_v9 = vand.u32 4294901760, %v1022_v29 }
  0xca   :  { %1116 = vmatpush.msrb.mxu3 %v2062_v41  ;;  %982 = vmatpush.msrb.mxu1 %v981_v46 }
  0xcb   :  { %901 = vmatpush.msrb.mxu0 %v2052_v7  ;;  %1069 = vmatpush.msrb.mxu2 %v996_v62 }
  0xcc   :  { %1118 = vmatpush.msrb.mxu3 %v2077_v59  ;;  %988 = vmatpush.msrb.mxu1 %v987_v44 }
  0xcd   :  { %903 = vmatpush.msrb.mxu0 %v2062_v41  ;;  %1072 = vmatpush.msrb.mxu2 %v1002_v14 }
  0xce   :  { %1120 = vmatpush.msrb.mxu3 %v2085_v49  ;;  %994 = vmatpush.msrb.mxu1 %v993_v33 }
  0xcf   :  { %905 = vmatpush.msrb.mxu0 %v2077_v59  ;;  %1075 = vmatpush.msrb.mxu2 %v1008_v52 }
  0xd0   :  { %1122 = vmatpush.msrb.mxu3 %v2095_v55  ;;  %1000 = vmatpush.msrb.mxu1 %v999_v42 }
  0xd1   :  { %907 = vmatpush.msrb.mxu0 %v2085_v49  ;;  %1078 = vmatpush.msrb.mxu2 %v1014_v0 }
  0xd2   :  { %1124 = vmatpush.msrb.mxu3 %v2107_v53  ;;  %1006 = vmatpush.msrb.mxu1 %v1005_v30 }
  0xd3   :  { %909 = vmatpush.msrb.mxu0 %v2095_v55  ;;  %1081 = vmatpush.msrb.mxu2 %v1020_v26 }
  0xd4   :  { %1290 = vmatpush.msra.mxu3 %v1951_v47  ;;  %1012 = vmatpush.msrb.mxu1 %v1011_v10 }
  0xd5   :  { %911 = vmatpush.msrb.mxu0 %v2107_v53  ;;  %1274 = vmatpush.msra.mxu2 %v1964_v60 }
  0xd6   :  { %1291 = vmatpush.msra.mxu3 %v1957_v31  ;;  %1018 = vmatpush.msrb.mxu1 %v1017_v28 }
  0xd7   :  { %1141 = vmatpush.msra.mxu0 %v1964_v60  ;;  %1275 = vmatpush.msra.mxu2 %v1975_v38 }
  0xd8   :  { %1292 = vmatpush.msra.mxu3 %v1967_v15  ;;  %1024 = vmatpush.msrb.mxu1 %v1023_v9 }
  0xd9   :  { %1145 = vmatpush.msra.mxu0 %v1975_v38  ;;  %1276 = vmatpush.msra.mxu2 %v1986_v21 }
  0xda   :  { %1212 = vmatpush.msra.mxu1 %v1951_v47  ;;  %1293 = vmatpush.msra.mxu3 %v1978_v2  ;;  %v104_v47 = vld [vmem:[%s2226_s2] sm:$0x3] }
  0xdb   :  { %1149 = vmatpush.msra.mxu0 %v1986_v21  ;;  %1277 = vmatpush.msra.mxu2 %v1997_v58 }
  0xdc   :  { %1214 = vmatpush.msra.mxu1 %v1957_v31  ;;  %1294 = vmatpush.msra.mxu3 %v1990_v36 }
  0xdd   :  { %1153 = vmatpush.msra.mxu0 %v1997_v58  ;;  %1278 = vmatpush.msra.mxu2 %v2011_v8 }
  0xde   :  { %1216 = vmatpush.msra.mxu1 %v1967_v15  ;;  %1295 = vmatpush.msra.mxu3 %v1999_v63 }
  0xdf   :  { %1157 = vmatpush.msra.mxu0 %v2011_v8  ;;  %1279 = vmatpush.msra.mxu2 %v2017_v16 }
  0xe0   :  { %1218 = vmatpush.msra.mxu1 %v1978_v2  ;;  %1296 = vmatpush.msra.mxu3 %v2009_v54 }
  0xe1   :  { %1161 = vmatpush.msra.mxu0 %v2017_v16  ;;  %1280 = vmatpush.msra.mxu2 %v2029_v27  ;;  %v107_v16 = vperm.slane %v104_v47, 1 }
  0xe2   :  { %1220 = vmatpush.msra.mxu1 %v1990_v36  ;;  %1297 = vmatpush.msra.mxu3 %v2020_v17  ;;  %v106_v36 = vperm.slane %v104_v47, 0 }
  0xe3   :  { %1165 = vmatpush.msra.mxu0 %v2029_v27  ;;  %1281 = vmatpush.msra.mxu2 %v2040_v12 }
  0xe4   :  { %1222 = vmatpush.msra.mxu1 %v1999_v63  ;;  %1298 = vmatpush.msra.mxu3 %v2032_v48 }
  0xe5   :  { %1169 = vmatpush.msra.mxu0 %v2040_v12  ;;  %1282 = vmatpush.msra.mxu2 %v2050_v56 }
  0xe6   :  { %1224 = vmatpush.msra.mxu1 %v2009_v54  ;;  %1299 = vmatpush.msra.mxu3 %v2044_v25 }
  0xe7   :  { %1173 = vmatpush.msra.mxu0 %v2050_v56  ;;  %1283 = vmatpush.msra.mxu2 %v2066_v32 }
  0xe8   :  { %1226 = vmatpush.msra.mxu1 %v2020_v17  ;;  %1300 = vmatpush.msra.mxu3 %v2052_v7 }
  0xe9   :  { %1177 = vmatpush.msra.mxu0 %v2066_v32  ;;  %1284 = vmatpush.msra.mxu2 %v2071_v40 }
  0xea   :  { %1228 = vmatpush.msra.mxu1 %v2032_v48  ;;  %1301 = vmatpush.msra.mxu3 %v2062_v41 }
  0xeb   :  { %1181 = vmatpush.msra.mxu0 %v2071_v40  ;;  %1285 = vmatpush.msra.mxu2 %v2083_v34 }
  0xec   :  { %1230 = vmatpush.msra.mxu1 %v2044_v25  ;;  %1302 = vmatpush.msra.mxu3 %v2077_v59 }
  0xed   :  { %1185 = vmatpush.msra.mxu0 %v2083_v34  ;;  %1286 = vmatpush.msra.mxu2 %v2099_v5 }
  0xee   :  { %1232 = vmatpush.msra.mxu1 %v2052_v7  ;;  %1303 = vmatpush.msra.mxu3 %v2085_v49 }
  0xef   :  { %1189 = vmatpush.msra.mxu0 %v2099_v5  ;;  %1287 = vmatpush.msra.mxu2 %v2104_v45 }
  0xf0   :  { %1234 = vmatpush.msra.mxu1 %v2062_v41  ;;  %1304 = vmatpush.msra.mxu3 %v2095_v55 }
  0xf1   :  { %1193 = vmatpush.msra.mxu0 %v2104_v45  ;;  %1288 = vmatpush.msra.mxu2 %v2115_v24 }
  0xf2   :  { %1236 = vmatpush.msra.mxu1 %v2077_v59  ;;  %1305 = vmatpush.msra.mxu3 %v2107_v53 }
  0xf3   :  { %1197 = vmatpush.msra.mxu0 %v2115_v24  ;;  %1289 = vmatpush.msra.mxu2 %v2125_v18 }
  0xf4   :  { %1238 = vmatpush.msra.mxu1 %v2085_v49 }
  0xf5   :  { %1201 = vmatpush.msra.mxu0 %v2125_v18 }
  0xf6   :  { %1240 = vmatpush.msra.mxu1 %v2095_v55 }
  0xf8   :  { %1242 = vmatpush.msra.mxu1 %v2107_v53 }
 0x104   :  { %v2112_v22 = vpop.f32.mrf.mxu1 }
 0x10c   :  { %v2141_v13 = vpop.f32.mrf.mxu1 }
 0x10d   :  { %v2120_v57 = vpop.f32.mrf.mxu0  ;;  %v2122_v50 = vpop.f32.mrf.mxu2 }
 0x10e   :  { %v149_v63 = vadd.f32 %v2120_v57, %v106_v36 }
 0x10f   :  { %v2129_v19 = vpop.f32.mrf.mxu3 }
 0x110   :  { %v258_v8 = vadd.f32 %v2112_v22, %v149_v63 }
 0x112   :  { %v316_v12 = vadd.f32 %v2122_v50, %v258_v8 }
 0x114   :  { %v360_v7 = vadd.f32 %v2129_v19, %v316_v12 }
 0x116   :  { %v2149_v38 = vpop.f32.mrf.mxu2  ;;  %v475_v31 = vpop.f32.mrf.mxu1 }
 0x117   :  { %v2147_v60 = vpop.f32.mrf.mxu0 }
 0x118   :  { %v157_v25 = vadd.f32 %v2147_v60, %v106_v36 }
 0x119   :  { %v2155_v21 = vpop.f32.mrf.mxu3 }
 0x11a   :  { %v262_v61 = vadd.f32 %v2141_v13, %v157_v25  ;;  %v1321_v13 = vld [vmem:[%s2228_s4] ss:$0 sm:$0xff] }
 0x11c   :  { %v321_v40 = vadd.f32 %v2149_v38, %v262_v61 }
 0x11e   :  { %v366_v34 = vadd.f32 %v2155_v21, %v321_v40 }
 0x120   :  { %v520_v2 = vpop.f32.mrf.mxu2  ;;  %v479_v54 = vpop.f32.mrf.mxu1 }
 0x121   :  { %v434_v15 = vpop.f32.mrf.mxu0  ;;  %v521_v56 = vadd.f32 %v520_v2, %v107_v16 }
 0x122   :  { %v435_v32 = vadd.f32 %v434_v15, %v360_v7 }
 0x123   :  { %v629_v58 = vpop.f32.mrf.mxu3 }
 0x124   :  { %v630_v35 = vadd.f32 %v629_v58, %v521_v56  ;;  %v476_v1 = vadd.f32 %v475_v31, %v435_v32 }
 0x126   :  { %v854_v39 = vmax.f32 %v476_v1, 0.0 }
 0x12a   :  { %v528_v27 = vpop.f32.mrf.mxu2  ;;  %v731_v3 = vpop.f32.mrf.mxu1 }
 0x12b   :  { %v438_v17 = vpop.f32.mrf.mxu0  ;;  %v529_v62 = vadd.f32 %v528_v27, %v107_v16 }
 0x12c   :  { %v439_v33 = vadd.f32 %v438_v17, %v366_v34 }
 0x12d   :  { %v633_v48 = vpop.f32.mrf.mxu3 }
 0x12e   :  { %v634_v49 = vadd.f32 %v633_v48, %v529_v62  ;;  %v480_v45 = vadd.f32 %v479_v54, %v439_v33 }
 0x130   :  { %v856_v24 = vmax.f32 %v480_v45, 0.0 }
 0x132   :  { %v737_v55 = vpop.f32.mrf.mxu1 }
 0x133   :  { %v687_v41 = vpop.f32.mrf.mxu0  ;;  %v806_v46 = vpop.f32.mrf.mxu2 }
 0x134   :  { %v688_v43 = vadd.f32 %v687_v41, %v630_v35 }
 0x136   :  { %v732_v4 = vadd.f32 %v731_v3, %v688_v43  ;;  %v847_v59 = vpop.f32.mrf.mxu3 }
 0x138   :  { %v807_v20 = vadd.f32 %v806_v46, %v732_v4 }
 0x13a   :  { %v848_v44 = vadd.f32 %v847_v59, %v807_v20 }
 0x13b   :  { %v692_v14 = vpop.f32.mrf.mxu0  ;;  %v810_v42 = vpop.f32.mrf.mxu2 }
 0x13c   :  { %v855_v51 = vmax.f32 %v848_v44, 0.0  ;;  %v693_v52 = vadd.f32 %v692_v14, %v634_v49 }
 0x13e   :  { %v858_v5 = vmax.f32 %v854_v39, %v855_v51  ;;  %v738_v37 = vadd.f32 %v737_v55, %v693_v52  ;;  %v851_v6 = vpop.f32.mrf.mxu3 }
 0x140   :  { %v912_v0 = vand.u32 4294901760, %v858_v5  ;;  %v811_v53 = vadd.f32 %v810_v42, %v738_v37 }
 0x142   :  { %v913_v22 = vsub.f32 %v858_v5, %v912_v0  ;;  %v852_v23 = vadd.f32 %v851_v6, %v811_v53  ;;  %1026 = vmatmul.f32.vlgmr.msrb.gmra.mxu1 %v912_v0 }
 0x144   :  { %v857_v26 = vmax.f32 %v852_v23, 0.0  ;;  %1084 = vmatmul.f32.vlgmr.msrb.gmra.mxu2 %v913_v22  ;;  %v914_v30 = vand.u32 4294901760, %v913_v22 }
 0x146   :  { %v859_v57 = vmax.f32 %v856_v24, %v857_v26  ;;  %1128 = vmatmul.f32.vlgmr.msrb.gmra.mxu3 %v914_v30  ;;  %v915_v50 = vsub.f32 %v913_v22, %v914_v30 }
 0x148   :  { %v920_v10 = vand.u32 4294901760, %v859_v57  ;;  %v916_v11 = vand.u32 4294901760, %v915_v50 }
 0x14a   :  { %917 = vmatmul.f32.vlgmr.msrb.gmra.mxu0 %v916_v11  ;;  %1030 = vmatmul.f32.gmra.mxu1 %v920_v10  ;;  %v921_v18 = vsub.f32 %v859_v57, %v920_v10 }
 0x14c   :  { %1089 = vmatmul.f32.gmra.mxu2 %v921_v18  ;;  %v922_v19 = vand.u32 4294901760, %v921_v18 }
 0x14e   :  { %1134 = vmatmul.f32.gmra.mxu3 %v922_v19  ;;  %v923_v28 = vsub.f32 %v921_v18, %v922_v19 }
 0x150   :  { %v924_v29 = vand.u32 4294901760, %v923_v28 }
 0x152   :  { %925 = vmatmul.f32.gmra.mxu0 %v924_v29  ;;  %1244 = vmatmul.f32.vlgmr.msra.gmra.mxu1 %v912_v0 }
 0x154   :  { %1207 = vmatmul.f32.vlgmr.msra.gmra.mxu2 %v920_v10 }
 0x156   :  { %1248 = vmatmul.f32.vlgmr.msra.gmra.mxu3 %v920_v10 }
 0x15a   :  { %1203 = vmatmul.f32.vlgmr.msra.gmra.mxu0 %v912_v0 }
 0x1bf   :  { %v1027_v9 = vpop.f32.mrf.mxu1 }
 0x1c7   :  { %v918_v60 = vpop.f32.mrf.mxu0  ;;  %v1085_v38 = vpop.f32.mrf.mxu2 }
 0x1c8   :  { %v919_v47 = vadd.f32 %v1321_v13, %v918_v60  ;;  %v1031_v15 = vpop.f32.mrf.mxu1 }
 0x1c9   :  { %v1129_v21 = vpop.f32.mrf.mxu3 }
 0x1ca   :  { %v1028_v31 = vadd.f32 %v1027_v9, %v919_v47 }
 0x1cc   :  { %v1086_v54 = vadd.f32 %v1085_v38, %v1028_v31 }
 0x1ce   :  { %v1130_v17 = vadd.f32 %v1129_v21, %v1086_v54 }
 0x1cf   :  { %v926_v2 = vpop.f32.mrf.mxu0  ;;  %v1090_v58 = vpop.f32.mrf.mxu2 }
 0x1d0   :  { %v927_v36 = vadd.f32 %v1321_v13, %v926_v2  ;;  %v1245_v56 = vpop.f32.mrf.mxu1 }
 0x1d1   :  { %v1135_v63 = vpop.f32.mrf.mxu3 }
 0x1d2   :  { %v1032_v8 = vadd.f32 %v1031_v15, %v927_v36 }
 0x1d4   :  { %v1091_v16 = vadd.f32 %v1090_v58, %v1032_v8 }
 0x1d6   :  { %v1136_v27 = vadd.f32 %v1135_v63, %v1091_v16 }
 0x1d7   :  { %v1204_v48 = vpop.f32.mrf.mxu0  ;;  %v1208_v25 = vpop.f32.mrf.mxu2 }
 0x1d8   :  { %v1205_v12 = vadd.f32 %v1204_v48, %v1130_v17  ;;  %v1209_v7 = vadd.f32 %v1208_v25, %v1136_v27 }
 0x1d9   :  { %v1249_v61 = vpop.f32.mrf.mxu3 }
 0x1da   :  { %v1246_v35 = vadd.f32 %v1245_v56, %v1205_v12  ;;  %v1250_v3 = vadd.f32 %v1249_v61, %v1209_v7 }
 0x1dc   :  { %1253 = vst.msk [vmem:[%s2229_s5] sm:$0xff] %vm1252_vm10, %v1246_v35 }
 0x1dd   :  { %1254 = vst.msk [vmem:[%s2229_s5 + $0x8] sm:$0xff] %vm1252_vm10, %v1250_v3 }
 0x1de   :  { %1259 = vsyncpa [#allocation3], 1 }

</bundles_post_ra>
